<compile_context>
chip_gen: v6e
topology: v6e:2x2x1
jax: 0.10.0
libtpu: 0.0.40
codegen_flags: <defaults>
</compile_context>

<pallas_src>
from functools import partial

import jax
import jax.numpy as jnp
from jax.experimental import pallas as pl
from jax.experimental.pallas import tpu as pltpu


_TM_BUDGET = 512     # sublane-dim tile cap (x / out rows)
_TN_BUDGET = 2048    # lane-dense output tile cap (reduces x re-streaming ~ 1/tn)
_TK_BUDGET = 512     # reduction tile cap


def _round_up(x, m):
    return ((x + m - 1) // m) * m


def _chip_params():
    """Best-effort chip query.  A failed query only degrades performance
    (conservative v7x-sized VMEM assumption, 256 K-alignment), never correctness."""
    kind = ""
    try:
        kind = jax.devices()[0].device_kind.lower()
    except Exception:
        pass
    try:
        cap = pltpu.get_tpu_info().vmem_capacity_bytes
    except Exception:
        cap = 64 << 20  # conservative (v7x-sized) fallback
    is_v5e = ("v5e" in kind) or ("v5 lite" in kind) or ("v5litepod" in kind)
    is_v7 = "v7" in kind
    # MXU contraction pass width: 128 on v5e, 256 on v6e / v7x.
    return dict(kind=kind, vmem_cap=cap, k_align=128 if is_v5e else 256, is_v7=is_v7)


def _pick_tile(dim, budget, align):
    """Largest tile <= budget that never exceeds `dim`; either a multiple of
    `align` (ragged last block) or the full dim (both allowed block shapes)."""
    if dim >= budget:
        return budget
    if dim >= align:
        return (dim // align) * align
    return dim


# ---------------- kernels ----------------

def _linear_relu_kernel_singlek(x_ref, wt_ref, o_ref, *, apply_relu):
    """Whole-K matmul: no accumulator scratch, single store per tile."""
    x = x_ref[...]
    if x.dtype != wt_ref.dtype:
        x = x.astype(wt_ref.dtype)  # in-kernel VPU cast; avoids a wrapper HBM pass
    res = jnp.dot(x, wt_ref[...], preferred_element_type=jnp.float32)
    if apply_relu:
        res = jnp.maximum(res, 0.0)
    o_ref[...] = res.astype(o_ref.dtype)


def _linear_relu_kernel_multik(x_ref, wt_ref, o_ref, acc_ref, *, apply_relu):
    """K-tiled matmul with resident f32 accumulator; fused ReLU in epilogue."""
    k = pl.program_id(2)

    @pl.when(k == 0)
    def _():
        acc_ref[...] = jnp.zeros_like(acc_ref)

    x = x_ref[...]
    if x.dtype != wt_ref.dtype:
        x = x.astype(wt_ref.dtype)
    acc_ref[...] += jnp.dot(x, wt_ref[...], preferred_element_type=jnp.float32)

    @pl.when(k == pl.num_programs(2) - 1)
    def _():
        res = acc_ref[...]
        if apply_relu:
            res = jnp.maximum(res, 0.0)
        o_ref[...] = res.astype(o_ref.dtype)


# ---------------- weight preparation (call once, cache) ----------------

def prepare_linear_block_weight(w_blocks, *, out_features, in_features,
                                compute_dtype=jnp.bfloat16,
                                tk_budget=_TK_BUDGET, k_align=None):
    """Merge MZIBlockLinear 'weight'-mode blocks into a padded, transposed,
    compute-dtype weight W^T of shape [Kp, Np].

    Do this ONCE per parameter update and reuse the result across forward calls —
    rebuilding it per call costs a full weight HBM round trip + an XLA transpose.

      Wt[b*kb + c, a*kb + r] = blocks[a, b, r, c]   (merge_chunks fused with .T)
    """
    p, q, kb, _ = w_blocks.shape
    wt = jnp.transpose(w_blocks, (1, 3, 0, 2)).reshape(q * kb, p * kb)
    wt = wt[:in_features, :out_features]                    # [K, N] = [in, out]

    if k_align is None:
        k_align = _chip_params()["k_align"]
    Kp = _round_up(in_features, k_align)
    if Kp > tk_budget:
        Kp = _round_up(Kp, tk_budget)                       # K grid divides exactly
    Np = _round_up(out_features, 128)                       # lane-dense columns

    return jnp.pad(wt.astype(compute_dtype),
                   ((0, Kp - in_features), (0, Np - out_features)))


# ---------------- forward ----------------

def linear_block_pallas(x, wt_prepared, *, out_features, activation=True,
                        out_dtype=None, tm_budget=_TM_BUDGET, tn_budget=_TN_BUDGET,
                        tk_budget=_TK_BUDGET, wt_buffers=2):
    """Forward pass of LinearBlock: y = relu(x @ W^T).

    x:           [B, in_features]  (float32 in)
    wt_prepared: [Kp, Np]          from prepare_linear_block_weight (cached)
    returns:     [B, out_features] in out_dtype (default: x.dtype)
    """
    M, K = x.shape
    Kp, Np = wt_prepared.shape
    N = out_features
    assert Kp >= K and Np >= N, "prepared weight smaller than problem"
    if out_dtype is None:
        out_dtype = x.dtype
    chip = _chip_params()

    # --- K tiling (exact: both operands zero-padded to Kp) ---
    tk = Kp if Kp <= tk_budget else tk_budget
    assert Kp % tk == 0, "tk_budget must match prepare_linear_block_weight"
    nk = Kp // tk

    # --- M / N tiling: blocks never exceed dims; ragged edges via cdiv grid ---
    tm = _pick_tile(M, tm_budget, 16)
    tn = _pick_tile(Np, tn_budget, 128)       # Np multiple of 128 -> lane-dense stores
    grid_m, grid_n = pl.cdiv(M, tm), pl.cdiv(Np, tn)

    # v7x has two TensorCores: a one-tile grid would leave one idle.
    if chip["is_v7"] and grid_m * grid_n == 1:
        if tn % 256 == 0:
            tn //= 2
        elif tm % 32 == 0:
            tm //= 2
        grid_m, grid_n = pl.cdiv(M, tm), pl.cdiv(Np, tn)

    # --- activation handling: avoid extra HBM passes over x ---
    compute_dtype = wt_prepared.dtype
    if Kp != K:
        # K zero-pad is mandatory (garbage in the K tail would corrupt real outputs);
        # it forces a copy anyway, so fold the bf16 cast into the same pass.
        x_in = jnp.pad(x.astype(compute_dtype), ((0, 0), (0, Kp - K)))
    elif x.dtype != compute_dtype and grid_n > 2:
        x_in = x.astype(compute_dtype)        # high reuse: one wrapper cast pays off
    else:
        x_in = x                              # low reuse: cast in-kernel, no extra pass

    # --- scoped VMEM sized from actual buffer bytes + headroom ---
    x_bytes = jnp.dtype(x_in.dtype).itemsize
    w_bytes = jnp.dtype(compute_dtype).itemsize
    o_bytes = jnp.dtype(out_dtype).itemsize
    need = (2 * tm * tk * x_bytes + 2 * tk * tn * w_bytes + 2 * tm * tn * o_bytes
            + (tm * tn * 4 if nk > 1 else 0))
    want = int(need * 1.3) + (2 << 20)
    cp_kwargs = {}
    if want > (16 << 20):                     # might exceed default scoped VMEM (v5e ~16 MiB)
        cp_kwargs["vmem_limit_bytes"] = int(min(max(want, need), chip["vmem_cap"] * 3 // 4))

    out_shape = jax.ShapeDtypeStruct((M, Np), out_dtype)

    if nk == 1:
        # Single K step: no accumulator scratch, no zero-init / readback.
        out = pl.pallas_call(
            partial(_linear_relu_kernel_singlek, apply_relu=activation),
            out_shape=out_shape,
            grid_spec=pltpu.PrefetchScalarGridSpec(
                num_scalar_prefetch=0,
                grid=(grid_m, grid_n),
                in_specs=[
                    pl.BlockSpec((tm, Kp), lambda i, j: (i, 0)),
                    pl.BlockSpec((Kp, tn), lambda i, j: (0, j)),
                ],
                out_specs=pl.BlockSpec((tm, tn), lambda i, j: (i, j)),
            ),
            compiler_params=pltpu.CompilerParams(
                dimension_semantics=("parallel", "parallel"), **cp_kwargs),
        )(x_in, wt_prepared)
    else:
        wt_spec_kwargs = {}
        if wt_buffers and wt_buffers > 2:     # optional deeper buffering if DMA exposed
            wt_spec_kwargs["pipeline_mode"] = pl.Buffered(wt_buffers)
        out = pl.pallas_call(
            partial(_linear_relu_kernel_multik, apply_relu=activation),
            out_shape=out_shape,
            grid_spec=pltpu.PrefetchScalarGridSpec(
                num_scalar_prefetch=0,
                grid=(grid_m, grid_n, nk),
                in_specs=[
                    pl.BlockSpec((tm, tk), lambda i, j, k: (i, k)),
                    pl.BlockSpec((tk, tn), lambda i, j, k: (k, j), **wt_spec_kwargs),
                ],
                out_specs=pl.BlockSpec((tm, tn), lambda i, j, k: (i, j)),
                scratch_shapes=[pltpu.VMEM((tm, tn), jnp.float32)],
            ),
            compiler_params=pltpu.CompilerParams(
                dimension_semantics=("parallel", "parallel", "arbitrary"),
                **cp_kwargs),
        )(x_in, wt_prepared)

    return out if Np == N else out[:, :N]


def linear_block_forward(x, w_blocks, *, out_features, in_features, **kwargs):
    """One-shot convenience.  In a real model, call prepare_linear_block_weight
    once per parameter update and reuse its result across forward calls."""
    wt = prepare_linear_block_weight(
        w_blocks, out_features=out_features, in_features=in_features,
        tk_budget=kwargs.get("tk_budget", _TK_BUDGET))
    return linear_block_pallas(x, wt, out_features=out_features, **kwargs)


# ---------------- self-test ----------------

def _reference(x, w_blocks, out_features, in_features, activation=True, cast_bf16=True):
    p, q, kb, _ = w_blocks.shape
    w_full = jnp.transpose(w_blocks, (0, 2, 1, 3)).reshape(p * kb, q * kb)
    w = w_full[:out_features, :in_features]
    if cast_bf16:
        xx = x.astype(jnp.bfloat16).astype(jnp.float32)
        ww = w.T.astype(jnp.bfloat16).astype(jnp.float32)
    else:
        xx, ww = x, w.T
    y = jnp.dot(xx, ww)
    if activation:
        y = jnp.maximum(y, 0.0)
    return y


if __name__ == "__main__":
    key = jax.random.PRNGKey(0)

    # Config 1: LinearBlock defaults (tiny — per-call launch overhead dominates;
    #           in a real model, batch several such blocks into one kernel or
    #           leave this size to XLA fusion).
    # Config 2: medium — single-K fast path, lane-dense padded N.
    # Config 3: forces the K-tiled accumulator path via a small tk_budget.
    # Config 4: bf16 output dtype (halved writeback bytes).
    configs = [
        dict(batch=8,  inf=32,  outf=32,  mb=8, tk_budget=_TK_BUDGET, out_dtype=None),
        dict(batch=64, inf=384, outf=256, mb=8, tk_budget=_TK_BUDGET, out_dtype=None),
        dict(batch=32, inf=384, outf=256, mb=8, tk_budget=128,        out_dtype=None),
        dict(batch=64, inf=384, outf=256, mb=8, tk_budget=_TK_BUDGET, out_dtype=jnp.bfloat16),
    ]

    for ci, cfg in enumerate(configs):
        B, inf, outf, mb = cfg["batch"], cfg["inf"], cfg["outf"], cfg["mb"]
        p = -(-outf // mb)
        q = -(-inf // mb)

        key, kx, kw = jax.random.split(key, 3)
        x = jax.random.normal(kx, (B, inf), dtype=jnp.float32)
        w_blocks = jax.random.normal(kw, (p, q, mb, mb), dtype=jnp.float32) \
            * (1.0 / jnp.sqrt(inf))

        # Weight prep: once per parameter update (cached in a real model).
        wt = prepare_linear_block_weight(
            w_blocks, out_features=outf, in_features=inf, tk_budget=cfg["tk_budget"])

        y = linear_block_pallas(
            x, wt, out_features=outf, activation=True,
            tk_budget=cfg["tk_budget"], out_dtype=cfg["out_dtype"])
        y = jax.block_until_ready(y)
        assert y.shape == (B, outf), f"config {ci}: bad output shape {y.shape}"

        y32 = y.astype(jnp.float32)
        # tight check vs bf16-compute / f32-accumulate reference
        y_ref_bf16 = _reference(x, w_blocks, outf, inf, cast_bf16=True)
        tol = 1e-3 if cfg["out_dtype"] is None else 5e-2
        assert jnp.allclose(y32, y_ref_bf16, atol=tol, rtol=tol), \
            f"config {ci}: bf16 ref mismatch"
        # loose sanity check vs full-f32 reference
        y_ref_f32 = _reference(x, w_blocks, outf, inf, cast_bf16=False)
        assert jnp.allclose(y32, y_ref_f32, atol=1e-1, rtol=1e-1), \
            f"config {ci}: f32 ref mismatch"

    print("KERNEL_OK")
</pallas_src>

<mosaic_0001>
module attributes {stable_mosaic.version = 11 : i64} {
  func.func @_linear_relu_kernel_singlek(%arg0: i32, %arg1: i32, %arg2: memref<8x256xbf16, #tpu.memory_space<vmem>>, %arg3: memref<256x128xbf16, #tpu.memory_space<vmem>>, %arg4: memref<8x128xf32, #tpu.memory_space<vmem>>) attributes {dimension_semantics = [#tpu.dimension_semantics<parallel>, #tpu.dimension_semantics<parallel>], iteration_bounds = array<i64: 1, 1>, scalar_prefetch = 0 : i64, scratch_operands = 0 : i64, tpu.core_type = #tpu.core_type<tc>, window_params = [{transform_indices = @transform_0, window_bounds = array<i64: 8, 256>}, {transform_indices = @transform_1, window_bounds = array<i64: 256, 128>}, {transform_indices = @transform_2, window_bounds = array<i64: 8, 128>}]} {
    %c0 = arith.constant 0 : index
    %c0_0 = arith.constant 0 : index
    %0 = vector.load %arg2[%c0, %c0_0] : memref<8x256xbf16, #tpu.memory_space<vmem>>, vector<8x256xbf16>
    %c0_1 = arith.constant 0 : index
    %c0_2 = arith.constant 0 : index
    %1 = vector.load %arg3[%c0_1, %c0_2] : memref<256x128xbf16, #tpu.memory_space<vmem>>, vector<256x128xbf16>
    %cst = arith.constant dense<0.000000e+00> : vector<8x128xf32>
    %2 = tpu.matmul %0, %1, %cst {dimension_numbers = #tpu.dot_dimension_numbers<[1], [0], [0], [1], [0, 0, 1, 1], [], []>} : vector<8x256xbf16>, vector<256x128xbf16>, vector<8x128xf32> -> vector<8x128xf32>
    %cst_3 = arith.constant 0.000000e+00 : f32
    %3 = vector.broadcast %cst_3 : f32 to vector<8x128xf32>
    %4 = arith.maximumf %2, %3 : vector<8x128xf32>
    %c0_4 = arith.constant 0 : index
    %c0_5 = arith.constant 0 : index
    %5 = vector.load %arg4[%c0_4, %c0_5] : memref<8x128xf32, #tpu.memory_space<vmem>>, vector<8x128xf32>
    tpu.vector_store %arg4[%c0_4, %c0_5], %4 {strides = array<i32>} : memref<8x128xf32, #tpu.memory_space<vmem>>, vector<8x128xf32>,
    return
  }
  func.func @transform_0(%arg0: i32, %arg1: i32) -> (i32, i32) {
    %c0_i32 = arith.constant 0 : i32
    %c0_i32_0 = arith.constant 0 : i32
    return %arg0, %c0_i32 : i32, i32
  }
  func.func @transform_1(%arg0: i32, %arg1: i32) -> (i32, i32) {
    %c0_i32 = arith.constant 0 : i32
    %c0_i32_0 = arith.constant 0 : i32
    return %c0_i32, %arg1 : i32, i32
  }
  func.func @transform_2(%arg0: i32, %arg1: i32) -> (i32, i32) {
    %c0_i32 = arith.constant 0 : i32
    return %arg0, %arg1 : i32, i32
  }
}

</mosaic_0001>

<bundles_post_ra>
// kernel: tpu_custom_call.1
= control target key start
LH: loop header
LB: loop body
LE: loop exit
PB: predicated region body
PF: predicated region fallthrough
CT: control target
= control target key end

     0   :  { %7 = vsyncpa [#allocation3], 0  ;;  %s391_s0 = inlined_call_operand.hbm [shape: bf16[8,256], index: 0, kind: input, shape index: {}]   ;;  %s392_s1 = inlined_call_operand.hbm [shape: bf16[256,128], index: 1, kind: input, shape index: {}]   ;;  %s393_s2 = inlined_call_operand.hbm [shape: f32[8,128], index: 2, kind: output, shape index: {}]  }
   0x1   :  { %8 = vsyncpa [#allocation6], 0 }
   0x2   :  { %9 = vsyncpa [#allocation4], 0  ;;  %s362_s9 = smov [#allocation2]   ;;  %s363_s11 = smov [#allocation5]  }
   0x3   :  { %s16_s10 = sshll.u32 %s362_s9, 4  ;;  %s25_s12 = sshll.u32 %s363_s11, 4  ;;  %s17_s10 = int_to_ptr.vmem [resolvable:$true] %s16_s10  ;;  %s26_s12 = int_to_ptr.vmem [resolvable:$true] %s25_s12 }
   0x4   :  { %s304_s13 = scalar_lea.vmem %s17_s10, 128  ;;  %p309_p1 = scmp.lt.s32.totalorder %s17_s10, %s17_s10 }
   0x5   :  { %p305_p0 = scmp.ne.s32.totalorder %s17_s10, %s304_s13  ;;  %p310_p2 = scmp.lt.s32.totalorder %s304_s13, %s304_s13 }
   0x7   :  { %p311_p3 = por %p310_p2, %p309_p1 }
   0x9   :  { %p312_p4 = pnand %p311_p3, %p305_p0 }
   0xb   :  { %315 = shalt.err (!%p312_p4)
}
   0xc   :  { %19 = dma.hbm_to_vmem [thread:$0]  %s391_s0, 128, %s17_s10, [#allocation3]  }
   0xd   :  { %s324_s16 = scalar_lea.vmem %s26_s12, 2048  ;;  %p329_p6 = scmp.lt.s32.totalorder %s26_s12, %s26_s12 }
   0xe   :  { %p325_p5 = scmp.ne.s32.totalorder %s26_s12, %s324_s16  ;;  %p330_p7 = scmp.lt.s32.totalorder %s324_s16, %s324_s16 }
  0x10   :  { %p331_p8 = por %p330_p7, %p329_p6 }
  0x12   :  { %p332_p9 = pnand %p331_p8, %p325_p5 }
  0x14   :  { %335 = shalt.err (!%p332_p9)
}
  0x15   :  { %s364_s17 = smov 64   ;;  %s365_s18 = smov 4  }
  0x16   :  { %31 = dma.hbm_to_vmem [thread:$0]  %s392_s1, 2048, %s26_s12, [#allocation6], %s364_s17, %s364_s17, %s365_s18  }
  0x17   :  { %356 = dma.done.wait [#allocation3], 128  }
  0x18   :  { %357 = vsyncadd [#allocation3], 4294967168 }
  0x19   :  { %358 = dma.done.wait [#allocation6], 2048  }
  0x1a   :  { %359 = vsyncadd [#allocation6], 4294965248  ;;  %v278_v0 = vld [vmem:[#allocation5 + $0x78] sm:$0xff]   ;;  %v280_v2 = vld [vmem:[#allocation5 + $0x70] sm:$0xff]   ;;  %s366_s0 = smov [#allocation7]  }
  0x1b   :  { %v279_v1 = vld [vmem:[#allocation5 + $0x38] sm:$0xff]   ;;  %251 = vmatprep.subr.bf16.mxu0 %v278_v0  ;;  %v281_v3 = vld [vmem:[#allocation5 + $0x30] sm:$0xff]   ;;  %v282_v4 = vld [vmem:[#allocation5 + $0x68] sm:$0xff]   ;;  %s223_s1 = sshll.u32 %s366_s0, 4  ;;  %s224_s1 = int_to_ptr.vmem [resolvable:$true] %s223_s1 }
  0x1c   :  { %252 = vmatpush3.bf16.msra.mxu0 %v279_v1  ;;  %v283_v5 = vld [vmem:[#allocation5 + $0x28] sm:$0xff]   ;;  %v284_v6 = vld [vmem:[#allocation5 + $0x60] sm:$0xff]   ;;  %v286_v8 = vld [vmem:[#allocation5 + $0x58] sm:$0xff]   ;;  %s336_s21 = scalar_lea.vmem %s224_s1, 128  ;;  %p341_p11 = scmp.lt.s32.totalorder %s224_s1, %s224_s1 }
  0x1d   :  { %253 = vmatprep.subr.bf16.mxu0 %v280_v2  ;;  %v285_v7 = vld [vmem:[#allocation5 + $0x20] sm:$0xff]   ;;  %v287_v9 = vld [vmem:[#allocation5 + $0x18] sm:$0xff]   ;;  %v288_v10 = vld [vmem:[#allocation5 + $0x50] sm:$0xff]   ;;  %p337_p10 = scmp.ne.s32.totalorder %s224_s1, %s336_s21  ;;  %p342_p12 = scmp.lt.s32.totalorder %s336_s21, %s336_s21 }
  0x1e   :  { %v39_v11 = vld [vmem:[#allocation2] sm:$0xff]  ;;  %v289_v13 = vld [vmem:[#allocation5 + $0x10] sm:$0xff]   ;;  %v290_v14 = vld [vmem:[#allocation5 + $0x48] sm:$0xff]  }
  0x1f   :  { %v234_v12 = vcombine.high %v39_v11, %v39_v11  ;;  %v291_v15 = vld [vmem:[#allocation5 + $0x8] sm:$0xff]   ;;  %v292_v16 = vld [vmem:[#allocation5 + $0x40] sm:$0xff]   ;;  %v233_v18 = vcombine.low %v39_v11, %v39_v11  ;;  %p343_p13 = por %p342_p12, %p341_p11 }
  0x20   :  { %254 = vmatpush3.bf16.msra.mxu0 %v281_v3  ;;  %v293_v17 = vld [vmem:[#allocation5] sm:$0xff]  }
  0x21   :  { %255 = vmatprep.subr.bf16.mxu0 %v282_v4  ;;  %207 = vmatprep.mubr.bf16.mxu0 %v234_v12  ;;  %p344_p0 = pnand %p343_p13, %p337_p10 }
  0x24   :  { %256 = vmatpush3.bf16.msra.mxu0 %v283_v5 }
  0x25   :  { %257 = vmatprep.subr.bf16.mxu0 %v284_v6 }
  0x28   :  { %258 = vmatpush3.bf16.msra.mxu0 %v285_v7 }
  0x29   :  { %259 = vmatprep.subr.bf16.mxu0 %v286_v8 }
  0x2c   :  { %260 = vmatpush3.bf16.msra.mxu0 %v287_v9 }
  0x2d   :  { %261 = vmatprep.subr.bf16.mxu0 %v288_v10 }
  0x30   :  { %262 = vmatpush3.bf16.msra.mxu0 %v289_v13 }
  0x31   :  { %263 = vmatprep.subr.bf16.mxu0 %v290_v14 }
  0x34   :  { %264 = vmatpush3.bf16.msra.mxu0 %v291_v15 }
  0x35   :  { %265 = vmatprep.subr.bf16.mxu0 %v292_v16 }
  0x38   :  { %266 = vmatpush3.bf16.msra.mxu0 %v293_v17 }
  0x3b   :  { %208 = vmatmul.mubr.bf16.vlgmr.msra.gmra.mxu0 %v233_v18 }
  0xfb   :  { %v267_v19 = vpop.f32.mrf.mxu0 }
  0xfd   :  { %v268_v20 = vpop.f32.mrf.mxu0 }
  0xfe   :  { %v269_v21 = vadd.f32 %v268_v20, %v267_v19 }
  0xff   :  { %v270_v22 = vpop.f32.mrf.mxu0 }
 0x100   :  { %v215_v23 = vmax.f32 %v269_v21, 0.0 }
 0x101   :  { %v271_v24 = vpop.f32.mrf.mxu0 }
 0x102   :  { %216 = vst [vmem:[#allocation7] sm:$0xff] %v215_v23 }
 0x103   :  { %347 = shalt.err (!%p344_p0)
}
 0x104   :  { %226 = dma.vmem_to_hbm [thread:$0]  %s224_s1, 128, %s393_s2, [#allocation4]  }
 0x105   :  { %360 = dma.done.wait [#allocation4], 128  }
 0x106   :  { %361 = vsyncadd [#allocation4], 4294967168 }
 0x107   :  { %230 = vsyncpa [#allocation3], 1 }
 0x108   :  { %231 = vsyncpa [#allocation6], 1 }
 0x109   :  { %232 = vsyncpa [#allocation4], 1 }

</bundles_post_ra>
